<compile_context>
chip_gen: v7x
topology: tpu7x:2x2x1
jax: 0.10.0
libtpu: 0.0.40
codegen_flags: <defaults>
</compile_context>

<pallas_src>
import functools

import jax
import jax.numpy as jnp
from jax.experimental import pallas as pl
from jax.experimental.pallas import tpu as pltpu


def _round_up(n, m):
    return ((n + m - 1) // m) * m


def _one_to_one_rnn_kernel(*refs, has_h, B, I, H, matmul_dtype):
    """refs = (x_ref[, h_ref], w_cell_ref, b_cell_ref, w_fc_ref, b_fc_ref,
               y_ref, h_out_ref, xh_scratch)."""
    if has_h:
        (x_ref, h_ref, w_cell_ref, b_cell_ref, w_fc_ref, b_fc_ref,
         y_ref, h_out_ref, xh_ref) = refs
    else:
        (x_ref, w_cell_ref, b_cell_ref, w_fc_ref, b_fc_ref,
         y_ref, h_out_ref, xh_ref) = refs
        h_ref = None

    # Build the fused [x | h] operand slab in VMEM (zero-padded to (Bp, Kp)).
    # Padded lanes must be exactly zero so that garbage (possible NaNs in
    # uninitialized scratch) never multiplies into the result.
    xh_ref[...] = jnp.zeros_like(xh_ref)
    xh_ref[:B, :I] = x_ref[...].astype(xh_ref.dtype)
    if has_h:
        xh_ref[:B, I:I + H] = h_ref[...].astype(xh_ref.dtype)

    # Fused RNNCell: pre = [x, h] @ [W_ih^T ; W_hh^T] + (b_ih + b_hh)
    xh = xh_ref[...].astype(matmul_dtype)                      # (Bp, Kp)
    pre = jnp.dot(xh, w_cell_ref[...],
                  preferred_element_type=jnp.float32)          # (Bp, Hp) f32 acc
    h_new = jnp.tanh(pre + b_cell_ref[...])                    # f32 bias add + EUP tanh

    # Linear + ReLU: y = relu(h_new @ W_fc^T + b_fc).
    # NOTE: in the bf16 path, y uses the bf16-cast h_new while the returned h
    # is the full-precision f32 value (intentional).
    y = jnp.dot(h_new.astype(matmul_dtype), w_fc_ref[...],
                preferred_element_type=jnp.float32)            # (Bp, Ip) f32 acc
    y = jnp.maximum(y + b_fc_ref[...], 0.0)                    # f32 epilogue

    h_out_ref[...] = h_new.astype(h_out_ref.dtype)
    y_ref[...] = y.astype(y_ref.dtype)


def init_params(key, input_size, hidden_size):
    """PyTorch-convention parameter shapes:
    RNNCell: W_ih (H, I), W_hh (H, H), b_ih (1, H), b_hh (1, H)
    Linear:  W_fc (I, H), b_fc (1, I)
    """
    k = jax.random.split(key, 6)
    s = 1.0 / jnp.sqrt(hidden_size)
    return {
        "w_ih": jax.random.uniform(k[0], (hidden_size, input_size), jnp.float32, -s, s),
        "w_hh": jax.random.uniform(k[1], (hidden_size, hidden_size), jnp.float32, -s, s),
        "b_ih": jax.random.uniform(k[2], (1, hidden_size), jnp.float32, -s, s),
        "b_hh": jax.random.uniform(k[3], (1, hidden_size), jnp.float32, -s, s),
        "w_fc": jax.random.uniform(k[4], (input_size, hidden_size), jnp.float32, -s, s),
        "b_fc": jax.random.uniform(k[5], (1, input_size), jnp.float32, -s, s),
    }


def pack_params(params, *, matmul_dtype=jnp.bfloat16):
    """One-time host-side repack: transpose, densely fuse W_ih^T/W_hh^T along
    the contraction dim (K = I + H, padded once to Kp = round_up(I+H, 128)),
    pre-sum the two cell biases, pad to lane-dense layouts.  Padded rows/cols
    are zero so padded output lanes come out exactly 0."""
    w_ih, w_hh = params["w_ih"], params["w_hh"]
    H, I = w_ih.shape
    Kp = _round_up(I + H, 128)
    Hp = _round_up(H, 128)
    Ip = _round_up(I, 128)

    # Dense stacked cell weight: rows [0:I) <- W_ih^T, rows [I:I+H) <- W_hh^T.
    w_cell = jnp.zeros((Kp, Hp), jnp.float32)
    w_cell = w_cell.at[:I, :H].set(w_ih.T)
    w_cell = w_cell.at[I:I + H, :H].set(w_hh.T)

    b_cell = jnp.zeros((1, Hp), jnp.float32).at[:, :H].set(
        params["b_ih"] + params["b_hh"])

    w_fc = jnp.zeros((Hp, Ip), jnp.float32).at[:H, :I].set(params["w_fc"].T)
    b_fc = jnp.zeros((1, Ip), jnp.float32).at[:, :I].set(params["b_fc"])

    return {
        "w_cell": w_cell.astype(matmul_dtype),
        "b_cell": b_cell,                       # biases stay f32
        "w_fc": w_fc.astype(matmul_dtype),
        "b_fc": b_fc,
        "input_size": I,
        "hidden_size": H,
        "matmul_dtype": matmul_dtype,
    }


def one_to_one_rnn(x, h, packed):
    """x: (B, I) f32, h: (B, H) f32 or None. Returns (y, h_new), f32."""
    B, I = x.shape
    H = packed["hidden_size"]
    assert I == packed["input_size"]
    Kp, Hp = packed["w_cell"].shape
    Ip = packed["w_fc"].shape[1]
    Bp = _round_up(B, 16)          # 16-row sublane packing for bf16 operands
    matmul_dtype = packed["matmul_dtype"]
    has_h = h is not None

    kernel = functools.partial(_one_to_one_rnn_kernel, has_h=has_h,
                               B=B, I=I, H=H, matmul_dtype=matmul_dtype)

    inputs = ((x,) + ((h,) if has_h else ())
              + (packed["w_cell"], packed["b_cell"], packed["w_fc"], packed["b_fc"]))

    w_itemsize = jnp.dtype(matmul_dtype).itemsize
    bytes_accessed = int(
        x.size * x.dtype.itemsize
        + (h.size * h.dtype.itemsize if has_h else 0)
        + (packed["w_cell"].size + packed["w_fc"].size) * w_itemsize
        + (packed["b_cell"].size + packed["b_fc"].size) * 4
        + (Bp * Ip + Bp * Hp) * 4)                    # outputs
    cost = pl.CostEstimate(
        flops=2 * Bp * Kp * Hp + 2 * Bp * Hp * Ip,
        transcendentals=Bp * Hp,
        bytes_accessed=bytes_accessed)

    vmem = pl.BlockSpec(memory_space=pltpu.MemorySpace.VMEM)
    # VMEM footprint here is < 200 KiB; well under the v7x 64 MiB / 32 MiB
    # scoped ceiling.  If I/H grow, set vmem_limit_bytes or tile Hp over a grid.
    y_p, h_p = pl.pallas_call(
        kernel,
        out_shape=(jax.ShapeDtypeStruct((Bp, Ip), jnp.float32),
                   jax.ShapeDtypeStruct((Bp, Hp), jnp.float32)),
        in_specs=[vmem] * len(inputs),
        out_specs=(vmem, vmem),
        scratch_shapes=[pltpu.VMEM((Bp, Kp), jnp.float32)],
        cost_estimate=cost,
    )(*inputs)

    return y_p[:B, :I], h_p[:B, :H]


def _reference(x, h, p):
    if h is None:
        h = jnp.zeros((x.shape[0], p["w_hh"].shape[0]), dtype=x.dtype)
    h_new = jnp.tanh(x @ p["w_ih"].T + p["b_ih"] + h @ p["w_hh"].T + p["b_hh"])
    y = jnp.maximum(h_new @ p["w_fc"].T + p["b_fc"], 0.0)
    return y, h_new


if __name__ == "__main__":
    B, INPUT_SIZE, HIDDEN_SIZE = 8, 16, 32

    key = jax.random.PRNGKey(0)
    kx, kh, kp = jax.random.split(key, 3)
    params = init_params(kp, INPUT_SIZE, HIDDEN_SIZE)

    x = jax.random.normal(kx, (B, INPUT_SIZE), jnp.float32)
    h0 = jax.random.normal(kh, (B, HIDDEN_SIZE), jnp.float32)

    y_ref, h_ref = _reference(x, h0, params)
    y0_ref, h0_ref_ = _reference(x, None, params)

    # ---- f32 matmul path (bit-comparable to the reference) ----
    packed_f32 = pack_params(params, matmul_dtype=jnp.float32)

    y, h_new = one_to_one_rnn(x, h0, packed_f32)
    jax.block_until_ready((y, h_new))
    assert jnp.allclose(y, y_ref, atol=1e-5, rtol=1e-5)
    assert jnp.allclose(h_new, h_ref, atol=1e-5, rtol=1e-5)

    y0, h0_new = one_to_one_rnn(x, None, packed_f32)   # h=None default path
    jax.block_until_ready((y0, h0_new))
    assert jnp.allclose(y0, y0_ref, atol=1e-5, rtol=1e-5)
    assert jnp.allclose(h0_new, h0_ref_, atol=1e-5, rtol=1e-5)

    # ---- bf16 matmul-operand path (default; all TPU generations), f32 acc ----
    packed_bf16 = pack_params(params)                  # matmul_dtype=bfloat16
    y_b, h_b = one_to_one_rnn(x, h0, packed_bf16)
    jax.block_until_ready((y_b, h_b))
    assert jnp.allclose(y_b, y_ref, atol=2e-2, rtol=2e-2)
    assert jnp.allclose(h_b, h_ref, atol=2e-2, rtol=2e-2)

    y0_b, h0_b = one_to_one_rnn(x, None, packed_bf16)
    jax.block_until_ready((y0_b, h0_b))
    assert jnp.allclose(y0_b, y0_ref, atol=2e-2, rtol=2e-2)
    assert jnp.allclose(h0_b, h0_ref_, atol=2e-2, rtol=2e-2)

    print("KERNEL_OK")
</pallas_src>

<mosaic_0001>
module attributes {stable_mosaic.version = 11 : i64} {
  func.func @_one_to_one_rnn_kernel(%arg0: memref<8x16xf32, #tpu.memory_space<vmem>>, %arg1: memref<8x32xf32, #tpu.memory_space<vmem>>, %arg2: memref<128x128xf32, #tpu.memory_space<vmem>>, %arg3: memref<1x128xf32, #tpu.memory_space<vmem>>, %arg4: memref<128x128xf32, #tpu.memory_space<vmem>>, %arg5: memref<1x128xf32, #tpu.memory_space<vmem>>, %arg6: memref<16x128xf32, #tpu.memory_space<vmem>>, %arg7: memref<16x128xf32, #tpu.memory_space<vmem>>, %arg8: memref<16x128xf32, #tpu.memory_space<vmem>>) attributes {dimension_semantics = [], scalar_prefetch = 0 : i64, scratch_operands = 1 : i64, tpu.core_type = #tpu.core_type<tc>} {
    %cst = arith.constant 0.000000e+00 : f32
    %0 = vector.broadcast %cst : f32 to vector<16x128xf32>
    %c0 = arith.constant 0 : index
    %c0_0 = arith.constant 0 : index
    %1 = vector.load %arg8[%c0, %c0_0] : memref<16x128xf32, #tpu.memory_space<vmem>>, vector<16x128xf32>
    tpu.vector_store %arg8[%c0, %c0_0], %0 {strides = array<i32>} : memref<16x128xf32, #tpu.memory_space<vmem>>, vector<16x128xf32>,
    %c0_1 = arith.constant 0 : index
    %c0_2 = arith.constant 0 : index
    %2 = vector.load %arg0[%c0_1, %c0_2] : memref<8x16xf32, #tpu.memory_space<vmem>>, vector<8x16xf32>
    %c0_3 = arith.constant 0 : index
    %c0_4 = arith.constant 0 : index
    %3 = vector.load %arg8[%c0_3, %c0_4] : memref<16x128xf32, #tpu.memory_space<vmem>>, vector<8x16xf32>
    tpu.vector_store %arg8[%c0_3, %c0_4], %2 {strides = array<i32>} : memref<16x128xf32, #tpu.memory_space<vmem>>, vector<8x16xf32>,
    %c0_5 = arith.constant 0 : index
    %c0_6 = arith.constant 0 : index
    %4 = vector.load %arg1[%c0_5, %c0_6] : memref<8x32xf32, #tpu.memory_space<vmem>>, vector<8x32xf32>
    %c0_7 = arith.constant 0 : index
    %c16 = arith.constant 16 : index
    %5 = vector.load %arg8[%c0_7, %c16] : memref<16x128xf32, #tpu.memory_space<vmem>>, vector<8x32xf32>
    tpu.vector_store %arg8[%c0_7, %c16], %4 {strides = array<i32>} : memref<16x128xf32, #tpu.memory_space<vmem>>, vector<8x32xf32>,
    %c0_8 = arith.constant 0 : index
    %c0_9 = arith.constant 0 : index
    %6 = vector.load %arg8[%c0_8, %c0_9] : memref<16x128xf32, #tpu.memory_space<vmem>>, vector<16x128xf32>
    %c0_10 = arith.constant 0 : index
    %c0_11 = arith.constant 0 : index
    %7 = vector.load %arg2[%c0_10, %c0_11] : memref<128x128xf32, #tpu.memory_space<vmem>>, vector<128x128xf32>
    %cst_12 = arith.constant dense<0.000000e+00> : vector<16x128xf32>
    %8 = tpu.matmul %6, %7, %cst_12 {dimension_numbers = #tpu.dot_dimension_numbers<[1], [0], [0], [1], [0, 0, 1, 1], [], []>} : vector<16x128xf32>, vector<128x128xf32>, vector<16x128xf32> -> vector<16x128xf32>
    %c0_13 = arith.constant 0 : index
    %c0_14 = arith.constant 0 : index
    %9 = vector.load %arg3[%c0_13, %c0_14] : memref<1x128xf32, #tpu.memory_space<vmem>>, vector<1x128xf32>
    %10 = vector.broadcast %9 : vector<1x128xf32> to vector<16x128xf32>
    %11 = arith.addf %8, %10 : vector<16x128xf32>
    %12 = math.tanh %11 : vector<16x128xf32>
    %c0_15 = arith.constant 0 : index
    %c0_16 = arith.constant 0 : index
    %13 = vector.load %arg4[%c0_15, %c0_16] : memref<128x128xf32, #tpu.memory_space<vmem>>, vector<128x128xf32>
    %cst_17 = arith.constant dense<0.000000e+00> : vector<16x128xf32>
    %14 = tpu.matmul %12, %13, %cst_17 {dimension_numbers = #tpu.dot_dimension_numbers<[1], [0], [0], [1], [0, 0, 1, 1], [], []>} : vector<16x128xf32>, vector<128x128xf32>, vector<16x128xf32> -> vector<16x128xf32>
    %c0_18 = arith.constant 0 : index
    %c0_19 = arith.constant 0 : index
    %15 = vector.load %arg5[%c0_18, %c0_19] : memref<1x128xf32, #tpu.memory_space<vmem>>, vector<1x128xf32>
    %16 = vector.broadcast %15 : vector<1x128xf32> to vector<16x128xf32>
    %17 = arith.addf %14, %16 : vector<16x128xf32>
    %cst_20 = arith.constant 0.000000e+00 : f32
    %18 = vector.broadcast %cst_20 : f32 to vector<16x128xf32>
    %19 = arith.maximumf %17, %18 : vector<16x128xf32>
    %c0_21 = arith.constant 0 : index
    %c0_22 = arith.constant 0 : index
    %20 = vector.load %arg7[%c0_21, %c0_22] : memref<16x128xf32, #tpu.memory_space<vmem>>, vector<16x128xf32>
    tpu.vector_store %arg7[%c0_21, %c0_22], %12 {strides = array<i32>} : memref<16x128xf32, #tpu.memory_space<vmem>>, vector<16x128xf32>,
    %c0_23 = arith.constant 0 : index
    %c0_24 = arith.constant 0 : index
    %21 = vector.load %arg6[%c0_23, %c0_24] : memref<16x128xf32, #tpu.memory_space<vmem>>, vector<16x128xf32>
    tpu.vector_store %arg6[%c0_23, %c0_24], %19 {strides = array<i32>} : memref<16x128xf32, #tpu.memory_space<vmem>>, vector<16x128xf32>,
    return
  }
}

</mosaic_0001>

<bundles_post_ra>
// kernel: tpu_custom_call.1
= control target key start
LH: loop header
LB: loop body
LE: loop exit
PB: predicated region body
PF: predicated region fallthrough
CT: control target
= control target key end

     0   :  { %13 = vsyncpa [#allocation4], 0  ;;  %s801_s0 = inlined_call_operand.hbm [shape: f32[8,16], index: 0, kind: input, shape index: {}]   ;;  %s802_s1 = inlined_call_operand.hbm [shape: f32[8,32], index: 1, kind: input, shape index: {}]   ;;  %s803_s2 = inlined_call_operand.hbm [shape: f32[128,128], index: 2, kind: input, shape index: {}]   ;;  %s804_s3 = inlined_call_operand.vmem [shape: f32[1,128], index: 3, kind: input, shape index: {}]   ;;  %s805_s4 = inlined_call_operand.hbm [shape: f32[128,128], index: 4, kind: input, shape index: {}]   ;;  %s806_s5 = inlined_call_operand.vmem [shape: f32[1,128], index: 5, kind: input, shape index: {}]   ;;  %s807_s6 = inlined_call_operand.hbm [shape: f32[16,128], index: 6, kind: output, shape index: {0}]   ;;  %s808_s7 = inlined_call_operand.hbm [shape: f32[16,128], index: 7, kind: output, shape index: {1}]  }
   0x1   :  { %14 = vsyncpa [#allocation7], 0 }
   0x2   :  { %15 = vsyncpa [#allocation10], 0 }
   0x3   :  { %16 = vsyncpa [#allocation5], 0 }
   0x4   :  { %17 = vsyncpa [#allocation13], 0  ;;  %s659_s24 = smov [#allocation6]   ;;  %s660_s26 = smov [#allocation3]  }
   0x5   :  { %s34_s25 = sshll.u32 %s659_s24, 4  ;;  %s24_s27 = sshll.u32 %s660_s26, 4  ;;  %s35_s25 = int_to_ptr.vmem [resolvable:$true] %s34_s25  ;;  %s25_s27 = int_to_ptr.vmem [resolvable:$true] %s24_s27 }
   0x6   :  { %s517_s30 = scalar_lea.hbm %s802_s1, 128 }
   0x7   :  { %p518_p0 = scmp.ne.s32.totalorder %s802_s1, %s517_s30  ;;  %p521_p1 = scmp.lt.u32.totalorder %s517_s30, %s802_s1 }
   0x9   :  { %p523_p2 = pnand %p521_p1, %p518_p0 }
   0xb   :  { %526 = shalt.err (!%p523_p2)
}
   0xc   :  { %s527_s12 = scalar_lea.vmem %s35_s25, 128  ;;  %p532_p4 = scmp.lt.s32.totalorder %s35_s25, %s35_s25 }
   0xd   :  { %p528_p3 = scmp.ne.s32.totalorder %s35_s25, %s527_s12  ;;  %p533_p5 = scmp.lt.s32.totalorder %s527_s12, %s527_s12 }
   0xf   :  { %p534_p6 = por %p533_p5, %p532_p4 }
  0x11   :  { %p535_p7 = pnand %p534_p6, %p528_p3 }
  0x13   :  { %538 = shalt.err (!%p535_p7)
}
  0x14   :  { %37 = dma.hbm_to_vmem [thread:$0]  %s802_s1, 128, %s35_s25, [#allocation7]  }
  0x15   :  { %s539_s17 = scalar_lea.hbm %s801_s0, 128 }
  0x16   :  { %p540_p8 = scmp.ne.s32.totalorder %s801_s0, %s539_s17  ;;  %p543_p9 = scmp.lt.u32.totalorder %s539_s17, %s801_s0 }
  0x18   :  { %p545_p10 = pnand %p543_p9, %p540_p8 }
  0x1a   :  { %548 = shalt.err (!%p545_p10)
}
  0x1b   :  { %s549_s22 = scalar_lea.vmem %s25_s27, 128  ;;  %p554_p12 = scmp.lt.s32.totalorder %s25_s27, %s25_s27 }
  0x1c   :  { %p550_p11 = scmp.ne.s32.totalorder %s25_s27, %s549_s22  ;;  %p555_p13 = scmp.lt.s32.totalorder %s549_s22, %s549_s22 }
  0x1e   :  { %p556_p0 = por %p555_p13, %p554_p12 }
  0x20   :  { %p557_p1 = pnand %p556_p0, %p550_p11 }
  0x22   :  { %560 = shalt.err (!%p557_p1)
}
  0x23   :  { %27 = dma.hbm_to_vmem [thread:$0]  %s801_s0, 128, %s25_s27, [#allocation4]  }
  0x24   :  { %s661_s24 = smov [#allocation8]   ;;  %s561_s29 = scalar_lea.hbm %s803_s2, 2048 }
  0x25   :  { %s43_s25 = sshll.u32 %s661_s24, 4  ;;  %p562_p2 = scmp.ne.s32.totalorder %s803_s2, %s561_s29  ;;  %s44_s25 = int_to_ptr.vmem [resolvable:$true] %s43_s25 }
  0x26   :  { %p565_p3 = scmp.lt.u32.totalorder %s561_s29, %s803_s2 }
  0x28   :  { %p567_p4 = pnand %p565_p3, %p562_p2 }
  0x2a   :  { %570 = shalt.err (!%p567_p4)
}
  0x2b   :  { %s571_s11 = scalar_lea.vmem %s44_s25, 2048  ;;  %p576_p6 = scmp.lt.s32.totalorder %s44_s25, %s44_s25 }
  0x2c   :  { %p572_p5 = scmp.ne.s32.totalorder %s44_s25, %s571_s11  ;;  %p577_p7 = scmp.lt.s32.totalorder %s571_s11, %s571_s11 }
  0x2e   :  { %p578_p8 = por %p577_p7, %p576_p6 }
  0x30   :  { %p579_p9 = pnand %p578_p8, %p572_p5 }
  0x32   :  { %582 = shalt.err (!%p579_p9)
}
  0x33   :  { %s662_s0 = smov 128   ;;  %s663_s27 = smov 8  }
  0x34   :  { %49 = dma.hbm_to_vmem [thread:$0]  %s803_s2, 2048, %s44_s25, [#allocation7], %s662_s0, %s662_s0, %s663_s27  }
  0x35   :  { %s664_s14 = smov [#allocation9]   ;;  %s583_s18 = scalar_lea.hbm %s805_s4, 2048 }
  0x36   :  { %s57_s15 = sshll.u32 %s664_s14, 4  ;;  %p584_p10 = scmp.ne.s32.totalorder %s805_s4, %s583_s18  ;;  %s58_s15 = int_to_ptr.vmem [resolvable:$true] %s57_s15 }
  0x37   :  { %p587_p11 = scmp.lt.u32.totalorder %s583_s18, %s805_s4 }
  0x39   :  { %p589_p12 = pnand %p587_p11, %p584_p10 }
  0x3b   :  { %592 = shalt.err (!%p589_p12)
}
  0x3c   :  { %s593_s1 = scalar_lea.vmem %s58_s15, 2048  ;;  %p598_p0 = scmp.lt.s32.totalorder %s58_s15, %s58_s15 }
  0x3d   :  { %p594_p13 = scmp.ne.s32.totalorder %s58_s15, %s593_s1  ;;  %p599_p1 = scmp.lt.s32.totalorder %s593_s1, %s593_s1 }
  0x3f   :  { %p600_p2 = por %p599_p1, %p598_p0 }
  0x41   :  { %p601_p3 = pnand %p600_p2, %p594_p13 }
  0x43   :  { %604 = shalt.err (!%p601_p3)
}
  0x44   :  { %63 = dma.hbm_to_vmem [thread:$0]  %s805_s4, 2048, %s58_s15, [#allocation10], %s662_s0, %s662_s0, %s663_s27  }
  0x45   :  { %649 = dma.done.wait [#allocation4], 128  }
  0x46   :  { %650 = vsyncadd [#allocation4], 4294967168 }
  0x47   :  { %651 = dma.done.wait [#allocation7], 2176  }
  0x48   :  { %652 = vsyncadd [#allocation7], 4294965120 }
  0x49   :  { %653 = dma.done.wait [#allocation10], 2048  }
  0x4a   :  { %654 = vsyncadd [#allocation10], 4294965248  ;;  %v665_v0 = vmov 0.0   ;;  %v83_v1 = vld [vmem:[#allocation6] sm:$0xff]  ;;  %v92_v2 = vld [vmem:[#allocation8] sm:$0xff]  ;;  %s666_s24 = smov 16  }
  0x4b   :  { %78 = vst [vmem:[#allocation2] sm:$0xff] %v665_v0  ;;  %v93_v3 = vld [vmem:[#allocation8 + $0x8] sm:$0xff]  ;;  %85 = vrot.lane.b32.xlu0 %v83_v1, %s666_s24  ;;  %v94_v5 = vld [vmem:[#allocation8 + $0x10] sm:$0xff]  ;;  %v95_v6 = vld [vmem:[#allocation8 + $0x18] sm:$0xff]  ;;  %vm81_vm0 = vcmask 130048   ;;  %vm88_vm1 = vcmask 392320  }
  0x4c   :  { %v439_v4 = vpack.c.bf16 %v93_v3, %v92_v2  ;;  %v443_v7 = vpack.c.bf16 %v95_v6, %v94_v5  ;;  %v96_v8 = vld [vmem:[#allocation8 + $0x20] sm:$0xff]  ;;  %v97_v9 = vld [vmem:[#allocation8 + $0x28] sm:$0xff]  ;;  %v80_v10 = vld [vmem:[#allocation3] sm:$0xff]  ;;  %s667_s26 = smov [#allocation12]  }
  0x4d   :  { %v447_v11 = vpack.c.bf16 %v97_v9, %v96_v8  ;;  %v98_v12 = vld [vmem:[#allocation8 + $0x30] sm:$0xff]  ;;  %v99_v13 = vld [vmem:[#allocation8 + $0x38] sm:$0xff]  ;;  %82 = vst.msk [vmem:[#allocation2] sm:$0xff] %vm81_vm0, %v80_v10  ;;  %v192_v14 = vld [vmem:[#allocation9] sm:$0xff]  ;;  %s313_s28 = sshll.u32 %s667_s26, 4  ;;  %s314_s28 = int_to_ptr.vmem [resolvable:$true] %s313_s28 }
  0x4e   :  { %440 = vmatprep.subr.bf16.mxu0 %v439_v4  ;;  %v193_v15 = vld [vmem:[#allocation9 + $0x8] sm:$0xff]  ;;  %v194_v16 = vld [vmem:[#allocation9 + $0x10] sm:$0xff]  ;;  %v195_v18 = vld [vmem:[#allocation9 + $0x18] sm:$0xff]  ;;  %v451_v22 = vpack.c.bf16 %v99_v13, %v98_v12  ;;  %s605_s29 = scalar_lea.vmem %s314_s28, 256  ;;  %p610_p5 = scmp.lt.s32.totalorder %s314_s28, %s314_s28 }
  0x4f   :  { %442 = vmatpush3.bf16.msra.mxu0 %v439_v4  ;;  %v471_v17 = vpack.c.bf16 %v193_v15, %v192_v14  ;;  %v475_v19 = vpack.c.bf16 %v195_v18, %v194_v16  ;;  %v196_v20 = vld [vmem:[#allocation9 + $0x20] sm:$0xff]  ;;  %v197_v21 = vld [vmem:[#allocation9 + $0x28] sm:$0xff]  ;;  %v198_v26 = vld [vmem:[#allocation9 + $0x30] sm:$0xff]  ;;  %p606_p4 = scmp.ne.s32.totalorder %s314_s28, %s605_s29  ;;  %p611_p6 = scmp.lt.s32.totalorder %s605_s29, %s605_s29 }
  0x50   :  { %444 = vmatprep.subr.bf16.mxu0 %v443_v7  ;;  %v100_v23 = vld [vmem:[#allocation8 + $0x40] sm:$0xff]  ;;  %v101_v24 = vld [vmem:[#allocation8 + $0x48] sm:$0xff]  ;;  %v479_v25 = vpack.c.bf16 %v197_v21, %v196_v20  ;;  %v199_v27 = vld [vmem:[#allocation9 + $0x38] sm:$0xff] }
  0x51   :  { %472 = vmatprep.subr.bf16.mxu1 %v471_v17  ;;  %v455_v28 = vpack.c.bf16 %v101_v24, %v100_v23  ;;  %v102_v29 = vld [vmem:[#allocation8 + $0x50] sm:$0xff]  ;;  %v103_v30 = vld [vmem:[#allocation8 + $0x58] sm:$0xff]  ;;  %v483_v31 = vpack.c.bf16 %v199_v27, %v198_v26  ;;  %v104_v33 = vld [vmem:[#allocation8 + $0x60] sm:$0xff]  ;;  %p612_p7 = por %p611_p6, %p610_p5 }
  0x52   :  { %474 = vmatpush3.bf16.msra.mxu1 %v471_v17  ;;  %v459_v32 = vpack.c.bf16 %v103_v30, %v102_v29  ;;  %v105_v34 = vld [vmem:[#allocation8 + $0x68] sm:$0xff]  ;;  %v106_v36 = vld [vmem:[#allocation8 + $0x70] sm:$0xff]  ;;  %v107_v37 = vld [vmem:[#allocation8 + $0x78] sm:$0xff] }
  0x53   :  { %446 = vmatpush3.bf16.msra.mxu0 %v443_v7  ;;  %476 = vmatprep.subr.bf16.mxu1 %v475_v19  ;;  %v463_v35 = vpack.c.bf16 %v105_v34, %v104_v33  ;;  %v467_v38 = vpack.c.bf16 %v107_v37, %v106_v36  ;;  %v200_v41 = vld [vmem:[#allocation9 + $0x40] sm:$0xff]  ;;  %v201_v42 = vld [vmem:[#allocation9 + $0x48] sm:$0xff]  ;;  %v202_v44 = vld [vmem:[#allocation9 + $0x50] sm:$0xff]  ;;  %p613_p8 = pnand %p612_p7, %p606_p4 }
  0x54   :  { %448 = vmatprep.subr.bf16.mxu0 %v447_v11  ;;  %v487_v43 = vpack.c.bf16 %v201_v42, %v200_v41  ;;  %v203_v45 = vld [vmem:[#allocation9 + $0x58] sm:$0xff]  ;;  %v204_v47 = vld [vmem:[#allocation9 + $0x60] sm:$0xff]  ;;  %v205_v48 = vld [vmem:[#allocation9 + $0x68] sm:$0xff] }
  0x55   :  { %v491_v46 = vpack.c.bf16 %v203_v45, %v202_v44  ;;  %v495_v49 = vpack.c.bf16 %v205_v48, %v204_v47  ;;  %v206_v50 = vld [vmem:[#allocation9 + $0x70] sm:$0xff]  ;;  %v207_v51 = vld [vmem:[#allocation9 + $0x78] sm:$0xff]  ;;  %v331_v53 = vld [vmem:[%s804_s3] ss:$0 sm:$0xff] }
  0x56   :  { %478 = vmatpush3.bf16.msra.mxu1 %v475_v19  ;;  %v499_v52 = vpack.c.bf16 %v207_v51, %v206_v50 }
  0x57   :  { %450 = vmatpush3.bf16.msra.mxu0 %v447_v11  ;;  %480 = vmatprep.subr.bf16.mxu1 %v479_v25 }
  0x58   :  { %452 = vmatprep.subr.bf16.mxu0 %v451_v22 }
  0x5a   :  { %482 = vmatpush3.bf16.msra.mxu1 %v479_v25 }
  0x5b   :  { %454 = vmatpush3.bf16.msra.mxu0 %v451_v22  ;;  %484 = vmatprep.subr.bf16.mxu1 %v483_v31 }
  0x5c   :  { %456 = vmatprep.subr.bf16.mxu0 %v455_v28 }
  0x5e   :  { %486 = vmatpush3.bf16.msra.mxu1 %v483_v31 }
  0x5f   :  { %458 = vmatpush3.bf16.msra.mxu0 %v455_v28  ;;  %488 = vmatprep.subr.bf16.mxu1 %v487_v43 }
  0x60   :  { %460 = vmatprep.subr.bf16.mxu0 %v459_v32 }
  0x62   :  { %490 = vmatpush3.bf16.msra.mxu1 %v487_v43 }
  0x63   :  { %462 = vmatpush3.bf16.msra.mxu0 %v459_v32  ;;  %492 = vmatprep.subr.bf16.mxu1 %v491_v46 }
  0x64   :  { %464 = vmatprep.subr.bf16.mxu0 %v463_v35 }
  0x66   :  { %494 = vmatpush3.bf16.msra.mxu1 %v491_v46 }
  0x67   :  { %466 = vmatpush3.bf16.msra.mxu0 %v463_v35  ;;  %496 = vmatprep.subr.bf16.mxu1 %v495_v49 }
  0x68   :  { %468 = vmatprep.subr.bf16.mxu0 %v467_v38 }
  0x6a   :  { %498 = vmatpush3.bf16.msra.mxu1 %v495_v49 }
  0x6b   :  { %470 = vmatpush3.bf16.msra.mxu0 %v467_v38  ;;  %500 = vmatprep.subr.bf16.mxu1 %v499_v52 }
  0x6e   :  { %502 = vmatpush3.bf16.msra.mxu1 %v499_v52 }
  0xbd   :  { %v86_v39 = vpop.permute.xlu0 %85 }
  0xbe   :  { %89 = vst.msk [vmem:[#allocation2] sm:$0xff] %vm88_vm1, %v86_v39 }
  0xc5   :  { %v90_v40 = vld [vmem:[#allocation2] sm:$0xff] }
  0xc6   :  { %401 = vmatprep.mubr.f32.mxu0 %v90_v40 }
  0xc7   :  { %402 = vmatmul.mubr.f32.vlgmr.msra.gmra.mrb[0].mxu0 %v665_v0 }
 0x19a   :  { %v403_v54 = vpop.f32.mrb[0].mxu0 }
 0x19b   :  { %v187_v55 = vadd.f32 %v403_v54, %v331_v53  ;;  %v181_v56 = vpop.f32.mrb[1].mxu0 }
 0x19c   :  { %v182_v57 = vadd.f32 %v331_v53, %v181_v56 }
 0x19d   :  { %513 = vtanh.f32 %v187_v55 }
 0x19e   :  { %515 = vtanh.f32 %v182_v57 }
 0x1a7   :  { %v514_v58 = vpop.eup %513 }
 0x1a8   :  { %v516_v59 = vpop.eup %515  ;;  %293 = vst [vmem:[#allocation12 + $0x8] sm:$0xff] %v514_v58 }
 0x1a9   :  { %292 = vst [vmem:[#allocation12] sm:$0xff] %v516_v59  ;;  %436 = vmatprep.mubr.f32.mxu1 %v516_v59 }
 0x1aa   :  { %437 = vmatmul.mubr.f32.vlgmr.msra.gmra.mrb[0].mxu1 %v514_v58 }
 0x1ab   :  { %616 = shalt.err (!%p613_p8)
}
 0x1ac   :  { %s617_s8 = scalar_lea.hbm %s808_s7, 256 }
 0x1ad   :  { %p618_p9 = scmp.ne.s32.totalorder %s808_s7, %s617_s8  ;;  %p621_p10 = scmp.lt.u32.totalorder %s617_s8, %s808_s7 }
 0x1af   :  { %p623_p11 = pnand %p621_p10, %p618_p9 }
 0x1b1   :  { %626 = shalt.err (!%p623_p11)
}
 0x1b2   :  { %319 = dma.vmem_to_hbm [thread:$0]  %s314_s28, 256, %s808_s7, [#allocation13], %s662_s0, %s662_s0, %s663_s27  }
 0x1b3   :  { %v332_v60 = vld [vmem:[%s806_s5] ss:$0 sm:$0xff]  ;;  %s668_s17 = smov [#allocation11]  }
 0x1b4   :  { %s301_s18 = sshll.u32 %s668_s17, 4  ;;  %s302_s18 = int_to_ptr.vmem [resolvable:$true] %s301_s18 }
 0x1b5   :  { %s627_s19 = scalar_lea.vmem %s302_s18, 256  ;;  %p632_p13 = scmp.lt.s32.totalorder %s302_s18, %s302_s18 }
 0x1b6   :  { %p628_p12 = scmp.ne.s32.totalorder %s302_s18, %s627_s19  ;;  %p633_p0 = scmp.lt.s32.totalorder %s627_s19, %s627_s19 }
 0x1b8   :  { %p634_p1 = por %p633_p0, %p632_p13 }
 0x1ba   :  { %p635_p2 = pnand %p634_p1, %p628_p12 }
 0x27d   :  { %v438_v61 = vpop.f32.mrb[0].mxu1 }
 0x27e   :  { %v287_v62 = vadd.f32 %v438_v61, %v332_v60  ;;  %v281_v63 = vpop.f32.mrb[1].mxu1 }
 0x27f   :  { %v282_v0 = vadd.f32 %v332_v60, %v281_v63 }
 0x280   :  { %v291_v1 = vmax.f32 %v287_v62, 0.0 }
 0x281   :  { %v290_v2 = vmax.f32 %v282_v0, 0.0 }
 0x282   :  { %295 = vst [vmem:[#allocation11 + $0x8] sm:$0xff] %v291_v1 }
 0x283   :  { %294 = vst [vmem:[#allocation11] sm:$0xff] %v290_v2 }
 0x284   :  { %638 = shalt.err (!%p635_p2)
}
 0x285   :  { %s639_s20 = scalar_lea.hbm %s807_s6, 256 }
 0x286   :  { %p640_p3 = scmp.ne.s32.totalorder %s807_s6, %s639_s20  ;;  %p643_p4 = scmp.lt.u32.totalorder %s639_s20, %s807_s6 }
 0x288   :  { %p645_p5 = pnand %p643_p4, %p640_p3 }
 0x28a   :  { %648 = shalt.err (!%p645_p5)
}
 0x28b   :  { %307 = dma.vmem_to_hbm [thread:$0]  %s302_s18, 256, %s807_s6, [#allocation5], %s662_s0, %s662_s0, %s663_s27  }
 0x28c   :  { %655 = dma.done.wait [#allocation5], 256  }
 0x28d   :  { %656 = vsyncadd [#allocation5], 4294967040 }
 0x28e   :  { %657 = dma.done.wait [#allocation13], 256  }
 0x28f   :  { %658 = vsyncadd [#allocation13], 4294967040 }
 0x290   :  { %326 = vsyncpa [#allocation4], 1 }
 0x291   :  { %327 = vsyncpa [#allocation7], 1 }
 0x292   :  { %328 = vsyncpa [#allocation10], 1 }
 0x293   :  { %329 = vsyncpa [#allocation5], 1 }
 0x294   :  { %330 = vsyncpa [#allocation13], 1 }

</bundles_post_ra>
